<compile_context>
chip_gen: v7x
topology: tpu7x:2x2x1
jax: 0.10.0
libtpu: 0.0.40
codegen_flags: <defaults>
</compile_context>

<pallas_src>
import functools

import jax
import jax.numpy as jnp
from jax.experimental import pallas as pl
from jax.experimental.pallas import tpu as pltpu

LANE = 128      # lane width: pad all feature dims to a multiple of this
SUBLANE = 8     # sublane width: batch tiles must be a multiple of this


def _round_up(x, m):
    return (x + m - 1) // m * m


def _mlp_kernel(x_ref,
                w1_ref, b1_ref,
                w2_ref, b2_ref,
                w3_ref, b3_ref,
                w4_ref, b4_ref,
                w5_ref, b5_ref,
                out_ref):
    """Fused forward: 4x (matmul + bias + relu) then matmul + bias.

    All refs are lane-dense (last dim a multiple of 128). Biases stay (1, N)
    and broadcast on the VPU against the (TB, N) matmul result — no reshapes
    or transposes inside the kernel.
    """
    h = x_ref[...]

    # Layer 1: Linear(states -> hidden) + ReLU
    h = jnp.dot(h, w1_ref[...], preferred_element_type=jnp.float32) + b1_ref[...]
    h = jnp.maximum(h, 0.0)

    # Layer 2: Linear(hidden -> hidden) + ReLU
    h = jnp.dot(h, w2_ref[...], preferred_element_type=jnp.float32) + b2_ref[...]
    h = jnp.maximum(h, 0.0)

    # Layer 3: Linear(hidden -> hidden) + ReLU
    h = jnp.dot(h, w3_ref[...], preferred_element_type=jnp.float32) + b3_ref[...]
    h = jnp.maximum(h, 0.0)

    # Layer 4: Linear(hidden -> hidden) + ReLU
    h = jnp.dot(h, w4_ref[...], preferred_element_type=jnp.float32) + b4_ref[...]
    h = jnp.maximum(h, 0.0)

    # Layer 5: Linear(hidden -> actions), no activation
    h = jnp.dot(h, w5_ref[...], preferred_element_type=jnp.float32) + b5_ref[...]

    out_ref[...] = h.astype(out_ref.dtype)


@functools.partial(jax.jit, static_argnames=("tb",))
def network4_forward(x, params, *, tb=256):
    """Run the fused MLP kernel.

    x: (B, states) float32
    params: dict with w1..w5 of shape (in, out) and b1..b5 of shape (1, out)
    tb: target batch tile (rows per grid step).
    """
    B, states = x.shape
    hidden = params["w1"].shape[1]
    actions = params["w5"].shape[1]

    # ---- lane/sublane padding (exact: all padding is zeros) ----------------
    Sp = _round_up(states, LANE)
    Hp = _round_up(hidden, LANE)
    Ap = _round_up(actions, LANE)

    TB = min(tb, _round_up(B, SUBLANE))
    Bp = _round_up(B, TB)
    grid_b = pl.cdiv(Bp, TB)

    xp = jnp.pad(x, ((0, Bp - B), (0, Sp - states)))

    def pad_w(w, rp, cp):
        return jnp.pad(w, ((0, rp - w.shape[0]), (0, cp - w.shape[1])))

    def pad_b(b, cp):
        return jnp.pad(b, ((0, 0), (0, cp - b.shape[1])))

    w1 = pad_w(params["w1"], Sp, Hp); b1 = pad_b(params["b1"], Hp)
    w2 = pad_w(params["w2"], Hp, Hp); b2 = pad_b(params["b2"], Hp)
    w3 = pad_w(params["w3"], Hp, Hp); b3 = pad_b(params["b3"], Hp)
    w4 = pad_w(params["w4"], Hp, Hp); b4 = pad_b(params["b4"], Hp)
    w5 = pad_w(params["w5"], Hp, Ap); b5 = pad_b(params["b5"], Ap)

    # ---- BlockSpecs --------------------------------------------------------
    # x / out: tiled over the batch axis.  Weights / biases: constant block
    # index -> fetched once, resident in VMEM for all grid steps.
    x_spec = pl.BlockSpec((TB, Sp), lambda i: (i, 0))
    out_spec = pl.BlockSpec((TB, Ap), lambda i: (i, 0))

    def const_spec(a):
        return pl.BlockSpec(a.shape, lambda i: (0, 0))

    weight_args = (w1, b1, w2, b2, w3, b3, w4, b4, w5, b5)

    out_padded = pl.pallas_call(
        _mlp_kernel,
        out_shape=jax.ShapeDtypeStruct((Bp, Ap), jnp.float32),
        grid=(grid_b,),
        in_specs=[x_spec] + [const_spec(a) for a in weight_args],
        out_specs=out_spec,
        compiler_params=pltpu.CompilerParams(
            dimension_semantics=("parallel",)),
    )(xp, *weight_args)

    return out_padded[:B, :actions]


def init_params(key, states, actions, hidden):
    """Deterministic init mirroring nn.Linear's default U(-1/sqrt(fan_in), ...).

    Weights are stored as (in_features, out_features) — the transpose of the
    PyTorch (out, in) convention — so the kernel computes x @ W + b.
    """
    dims = [(states, hidden), (hidden, hidden), (hidden, hidden),
            (hidden, hidden), (hidden, actions)]
    params = {}
    for i, (fan_in, fan_out) in enumerate(dims, start=1):
        key, kw, kb = jax.random.split(key, 3)
        bound = 1.0 / jnp.sqrt(jnp.float32(fan_in))
        params[f"w{i}"] = jax.random.uniform(
            kw, (fan_in, fan_out), jnp.float32, minval=-bound, maxval=bound)
        params[f"b{i}"] = jax.random.uniform(
            kb, (1, fan_out), jnp.float32, minval=-bound, maxval=bound)
    return params


def reference_forward(x, params):
    """Plain-JAX reference for correctness check."""
    h = x
    for i in range(1, 5):
        h = jnp.maximum(h @ params[f"w{i}"] + params[f"b{i}"], 0.0)
    return h @ params["w5"] + params["b5"]


if __name__ == "__main__":
    # Small shapes consistent with the module: states=16, hidden=32, actions=4.
    states, hidden, actions = 16, 32, 4

    key = jax.random.PRNGKey(0)
    key, kparams = jax.random.split(key)
    params = init_params(kparams, states, actions, hidden)

    # Case 1: tiny batch (single grid step, TB shrinks to 8).
    key, kx1 = jax.random.split(key)
    x_small = jax.random.normal(kx1, (8, states), dtype=jnp.float32)
    out_small = jax.block_until_ready(network4_forward(x_small, params))
    ref_small = reference_forward(x_small, params)
    assert out_small.shape == (8, actions)
    assert jnp.allclose(out_small, ref_small, atol=1e-4, rtol=1e-4), \
        "Pallas kernel mismatch vs reference (small batch)"

    # Case 2: batch that exercises the tiled grid + batch padding (TB=64, 4 steps).
    key, kx2 = jax.random.split(key)
    x_big = jax.random.normal(kx2, (200, states), dtype=jnp.float32)
    out_big = jax.block_until_ready(network4_forward(x_big, params, tb=64))
    ref_big = reference_forward(x_big, params)
    assert out_big.shape == (200, actions)
    assert jnp.allclose(out_big, ref_big, atol=1e-4, rtol=1e-4), \
        "Pallas kernel mismatch vs reference (tiled batch)"

    print("KERNEL_OK")
</pallas_src>

<mosaic_0001>
module attributes {stable_mosaic.version = 11 : i64} {
  func.func @_mlp_kernel(%arg0: i32, %arg1: memref<8x128xf32, #tpu.memory_space<vmem>>, %arg2: memref<128x128xf32, #tpu.memory_space<vmem>>, %arg3: memref<1x128xf32, #tpu.memory_space<vmem>>, %arg4: memref<128x128xf32, #tpu.memory_space<vmem>>, %arg5: memref<1x128xf32, #tpu.memory_space<vmem>>, %arg6: memref<128x128xf32, #tpu.memory_space<vmem>>, %arg7: memref<1x128xf32, #tpu.memory_space<vmem>>, %arg8: memref<128x128xf32, #tpu.memory_space<vmem>>, %arg9: memref<1x128xf32, #tpu.memory_space<vmem>>, %arg10: memref<128x128xf32, #tpu.memory_space<vmem>>, %arg11: memref<1x128xf32, #tpu.memory_space<vmem>>, %arg12: memref<8x128xf32, #tpu.memory_space<vmem>>) attributes {dimension_semantics = [#tpu.dimension_semantics<parallel>], iteration_bounds = array<i64: 1>, scalar_prefetch = 0 : i64, scratch_operands = 0 : i64, tpu.core_type = #tpu.core_type<tc>, window_params = [{transform_indices = @transform_0, window_bounds = array<i64: 8, 128>}, {pipeline_mode = #tpu.pipeline_mode<synchronous>, transform_indices = @transform_1, window_bounds = array<i64: 128, 128>}, {pipeline_mode = #tpu.pipeline_mode<synchronous>, transform_indices = @transform_2, window_bounds = array<i64: 1, 128>}, {pipeline_mode = #tpu.pipeline_mode<synchronous>, transform_indices = @transform_3, window_bounds = array<i64: 128, 128>}, {pipeline_mode = #tpu.pipeline_mode<synchronous>, transform_indices = @transform_4, window_bounds = array<i64: 1, 128>}, {pipeline_mode = #tpu.pipeline_mode<synchronous>, transform_indices = @transform_5, window_bounds = array<i64: 128, 128>}, {pipeline_mode = #tpu.pipeline_mode<synchronous>, transform_indices = @transform_6, window_bounds = array<i64: 1, 128>}, {pipeline_mode = #tpu.pipeline_mode<synchronous>, transform_indices = @transform_7, window_bounds = array<i64: 128, 128>}, {pipeline_mode = #tpu.pipeline_mode<synchronous>, transform_indices = @transform_8, window_bounds = array<i64: 1, 128>}, {pipeline_mode = #tpu.pipeline_mode<synchronous>, transform_indices = @transform_9, window_bounds = array<i64: 128, 128>}, {pipeline_mode = #tpu.pipeline_mode<synchronous>, transform_indices = @transform_10, window_bounds = array<i64: 1, 128>}, {transform_indices = @transform_11, window_bounds = array<i64: 8, 128>}]} {
    %c0 = arith.constant 0 : index
    %c0_0 = arith.constant 0 : index
    %0 = vector.load %arg1[%c0, %c0_0] : memref<8x128xf32, #tpu.memory_space<vmem>>, vector<8x128xf32>
    %c0_1 = arith.constant 0 : index
    %c0_2 = arith.constant 0 : index
    %1 = vector.load %arg2[%c0_1, %c0_2] : memref<128x128xf32, #tpu.memory_space<vmem>>, vector<128x128xf32>
    %cst = arith.constant dense<0.000000e+00> : vector<8x128xf32>
    %2 = tpu.matmul %0, %1, %cst {dimension_numbers = #tpu.dot_dimension_numbers<[1], [0], [0], [1], [0, 0, 1, 1], [], []>} : vector<8x128xf32>, vector<128x128xf32>, vector<8x128xf32> -> vector<8x128xf32>
    %c0_3 = arith.constant 0 : index
    %c0_4 = arith.constant 0 : index
    %3 = vector.load %arg3[%c0_3, %c0_4] : memref<1x128xf32, #tpu.memory_space<vmem>>, vector<1x128xf32>
    %4 = vector.broadcast %3 : vector<1x128xf32> to vector<8x128xf32>
    %5 = arith.addf %2, %4 : vector<8x128xf32>
    %cst_5 = arith.constant 0.000000e+00 : f32
    %6 = vector.broadcast %cst_5 : f32 to vector<8x128xf32>
    %7 = arith.maximumf %5, %6 : vector<8x128xf32>
    %c0_6 = arith.constant 0 : index
    %c0_7 = arith.constant 0 : index
    %8 = vector.load %arg4[%c0_6, %c0_7] : memref<128x128xf32, #tpu.memory_space<vmem>>, vector<128x128xf32>
    %cst_8 = arith.constant dense<0.000000e+00> : vector<8x128xf32>
    %9 = tpu.matmul %7, %8, %cst_8 {dimension_numbers = #tpu.dot_dimension_numbers<[1], [0], [0], [1], [0, 0, 1, 1], [], []>} : vector<8x128xf32>, vector<128x128xf32>, vector<8x128xf32> -> vector<8x128xf32>
    %c0_9 = arith.constant 0 : index
    %c0_10 = arith.constant 0 : index
    %10 = vector.load %arg5[%c0_9, %c0_10] : memref<1x128xf32, #tpu.memory_space<vmem>>, vector<1x128xf32>
    %11 = vector.broadcast %10 : vector<1x128xf32> to vector<8x128xf32>
    %12 = arith.addf %9, %11 : vector<8x128xf32>
    %cst_11 = arith.constant 0.000000e+00 : f32
    %13 = vector.broadcast %cst_11 : f32 to vector<8x128xf32>
    %14 = arith.maximumf %12, %13 : vector<8x128xf32>
    %c0_12 = arith.constant 0 : index
    %c0_13 = arith.constant 0 : index
    %15 = vector.load %arg6[%c0_12, %c0_13] : memref<128x128xf32, #tpu.memory_space<vmem>>, vector<128x128xf32>
    %cst_14 = arith.constant dense<0.000000e+00> : vector<8x128xf32>
    %16 = tpu.matmul %14, %15, %cst_14 {dimension_numbers = #tpu.dot_dimension_numbers<[1], [0], [0], [1], [0, 0, 1, 1], [], []>} : vector<8x128xf32>, vector<128x128xf32>, vector<8x128xf32> -> vector<8x128xf32>
    %c0_15 = arith.constant 0 : index
    %c0_16 = arith.constant 0 : index
    %17 = vector.load %arg7[%c0_15, %c0_16] : memref<1x128xf32, #tpu.memory_space<vmem>>, vector<1x128xf32>
    %18 = vector.broadcast %17 : vector<1x128xf32> to vector<8x128xf32>
    %19 = arith.addf %16, %18 : vector<8x128xf32>
    %cst_17 = arith.constant 0.000000e+00 : f32
    %20 = vector.broadcast %cst_17 : f32 to vector<8x128xf32>
    %21 = arith.maximumf %19, %20 : vector<8x128xf32>
    %c0_18 = arith.constant 0 : index
    %c0_19 = arith.constant 0 : index
    %22 = vector.load %arg8[%c0_18, %c0_19] : memref<128x128xf32, #tpu.memory_space<vmem>>, vector<128x128xf32>
    %cst_20 = arith.constant dense<0.000000e+00> : vector<8x128xf32>
    %23 = tpu.matmul %21, %22, %cst_20 {dimension_numbers = #tpu.dot_dimension_numbers<[1], [0], [0], [1], [0, 0, 1, 1], [], []>} : vector<8x128xf32>, vector<128x128xf32>, vector<8x128xf32> -> vector<8x128xf32>
    %c0_21 = arith.constant 0 : index
    %c0_22 = arith.constant 0 : index
    %24 = vector.load %arg9[%c0_21, %c0_22] : memref<1x128xf32, #tpu.memory_space<vmem>>, vector<1x128xf32>
    %25 = vector.broadcast %24 : vector<1x128xf32> to vector<8x128xf32>
    %26 = arith.addf %23, %25 : vector<8x128xf32>
    %cst_23 = arith.constant 0.000000e+00 : f32
    %27 = vector.broadcast %cst_23 : f32 to vector<8x128xf32>
    %28 = arith.maximumf %26, %27 : vector<8x128xf32>
    %c0_24 = arith.constant 0 : index
    %c0_25 = arith.constant 0 : index
    %29 = vector.load %arg10[%c0_24, %c0_25] : memref<128x128xf32, #tpu.memory_space<vmem>>, vector<128x128xf32>
    %cst_26 = arith.constant dense<0.000000e+00> : vector<8x128xf32>
    %30 = tpu.matmul %28, %29, %cst_26 {dimension_numbers = #tpu.dot_dimension_numbers<[1], [0], [0], [1], [0, 0, 1, 1], [], []>} : vector<8x128xf32>, vector<128x128xf32>, vector<8x128xf32> -> vector<8x128xf32>
    %c0_27 = arith.constant 0 : index
    %c0_28 = arith.constant 0 : index
    %31 = vector.load %arg11[%c0_27, %c0_28] : memref<1x128xf32, #tpu.memory_space<vmem>>, vector<1x128xf32>
    %32 = vector.broadcast %31 : vector<1x128xf32> to vector<8x128xf32>
    %33 = arith.addf %30, %32 : vector<8x128xf32>
    %c0_29 = arith.constant 0 : index
    %c0_30 = arith.constant 0 : index
    %34 = vector.load %arg12[%c0_29, %c0_30] : memref<8x128xf32, #tpu.memory_space<vmem>>, vector<8x128xf32>
    tpu.vector_store %arg12[%c0_29, %c0_30], %33 {strides = array<i32>} : memref<8x128xf32, #tpu.memory_space<vmem>>, vector<8x128xf32>,
    return
  }
  func.func @transform_0(%arg0: i32) -> (i32, i32) {
    %c0_i32 = arith.constant 0 : i32
    %c0_i32_0 = arith.constant 0 : i32
    return %arg0, %c0_i32 : i32, i32
  }
  func.func @transform_1(%arg0: i32) -> (i32, i32) {
    %c0_i32 = arith.constant 0 : i32
    %c0_i32_0 = arith.constant 0 : i32
    %c0_i32_1 = arith.constant 0 : i32
    return %c0_i32, %c0_i32_0 : i32, i32
  }
  func.func @transform_2(%arg0: i32) -> (i32, i32) {
    %c0_i32 = arith.constant 0 : i32
    %c0_i32_0 = arith.constant 0 : i32
    %c0_i32_1 = arith.constant 0 : i32
    return %c0_i32, %c0_i32_0 : i32, i32
  }
  func.func @transform_3(%arg0: i32) -> (i32, i32) {
    %c0_i32 = arith.constant 0 : i32
    %c0_i32_0 = arith.constant 0 : i32
    %c0_i32_1 = arith.constant 0 : i32
    return %c0_i32, %c0_i32_0 : i32, i32
  }
  func.func @transform_4(%arg0: i32) -> (i32, i32) {
    %c0_i32 = arith.constant 0 : i32
    %c0_i32_0 = arith.constant 0 : i32
    %c0_i32_1 = arith.constant 0 : i32
    return %c0_i32, %c0_i32_0 : i32, i32
  }
  func.func @transform_5(%arg0: i32) -> (i32, i32) {
    %c0_i32 = arith.constant 0 : i32
    %c0_i32_0 = arith.constant 0 : i32
    %c0_i32_1 = arith.constant 0 : i32
    return %c0_i32, %c0_i32_0 : i32, i32
  }
  func.func @transform_6(%arg0: i32) -> (i32, i32) {
    %c0_i32 = arith.constant 0 : i32
    %c0_i32_0 = arith.constant 0 : i32
    %c0_i32_1 = arith.constant 0 : i32
    return %c0_i32, %c0_i32_0 : i32, i32
  }
  func.func @transform_7(%arg0: i32) -> (i32, i32) {
    %c0_i32 = arith.constant 0 : i32
    %c0_i32_0 = arith.constant 0 : i32
    %c0_i32_1 = arith.constant 0 : i32
    return %c0_i32, %c0_i32_0 : i32, i32
  }
  func.func @transform_8(%arg0: i32) -> (i32, i32) {
    %c0_i32 = arith.constant 0 : i32
    %c0_i32_0 = arith.constant 0 : i32
    %c0_i32_1 = arith.constant 0 : i32
    return %c0_i32, %c0_i32_0 : i32, i32
  }
  func.func @transform_9(%arg0: i32) -> (i32, i32) {
    %c0_i32 = arith.constant 0 : i32
    %c0_i32_0 = arith.constant 0 : i32
    %c0_i32_1 = arith.constant 0 : i32
    return %c0_i32, %c0_i32_0 : i32, i32
  }
  func.func @transform_10(%arg0: i32) -> (i32, i32) {
    %c0_i32 = arith.constant 0 : i32
    %c0_i32_0 = arith.constant 0 : i32
    %c0_i32_1 = arith.constant 0 : i32
    return %c0_i32, %c0_i32_0 : i32, i32
  }
  func.func @transform_11(%arg0: i32) -> (i32, i32) {
    %c0_i32 = arith.constant 0 : i32
    %c0_i32_0 = arith.constant 0 : i32
    return %arg0, %c0_i32 : i32, i32
  }
}

</mosaic_0001>

<bundles_post_ra>
// kernel: network4_forward.1
= control target key start
LH: loop header
LB: loop body
LE: loop exit
PB: predicated region body
PF: predicated region fallthrough
CT: control target
= control target key end

     0   :  { %v901_v0 = vmov 0.0|0.0   ;;  %vm902_vm0 = vmmov 0   ;;  %v903_v4 = vmov 0.0   ;;  %s1275_s1 = inlined_call_operand.vmem [shape: f32[128,128], index: 1, kind: input, shape index: {}]   ;;  %s1276_s3 = inlined_call_operand.vmem [shape: f32[128,128], index: 3, kind: input, shape index: {}]   ;;  %s1277_s0 = inlined_call_operand.vmem [shape: f32[8,128], index: 0, kind: input, shape index: {}]   ;;  %s1278_s5 = inlined_call_operand.vmem [shape: f32[128,128], index: 5, kind: input, shape index: {}]   ;;  %s1279_s2 = inlined_call_operand.vmem [shape: f32[1,128], index: 2, kind: input, shape index: {}]   ;;  %s1280_s7 = inlined_call_operand.vmem [shape: f32[128,128], index: 7, kind: input, shape index: {}]   ;;  %s1281_s4 = inlined_call_operand.vmem [shape: f32[1,128], index: 4, kind: input, shape index: {}]   ;;  %s1282_s9 = inlined_call_operand.vmem [shape: f32[128,128], index: 9, kind: input, shape index: {}]   ;;  %s1283_s6 = inlined_call_operand.vmem [shape: f32[1,128], index: 6, kind: input, shape index: {}]   ;;  %s1284_s8 = inlined_call_operand.vmem [shape: f32[1,128], index: 8, kind: input, shape index: {}]   ;;  %s1285_s10 = inlined_call_operand.vmem [shape: f32[1,128], index: 10, kind: input, shape index: {}]   ;;  %s1286_s11 = inlined_call_operand.vmem [shape: f32[8,128], index: 11, kind: output, shape index: {}]  }
   0x1   :  { %778 = vmatprep.subr.bf16.mxu0 %v901_v0  ;;  %v39_v1 = vld [vmem:[%s1275_s1] sm:$0xff]  ;;  %v40_v2 = vld [vmem:[%s1275_s1 + $0x8] sm:$0xff]  ;;  %v41_v3 = vld [vmem:[%s1275_s1 + $0x10] sm:$0xff]  ;;  %635 = vmatprep.mubr.msk.f32.mxu0 %vm902_vm0, %v903_v4 }
   0x2   :  { %v779_v5 = vpack.c.bf16 %v40_v2, %v39_v1  ;;  %v42_v6 = vld [vmem:[%s1275_s1 + $0x18] sm:$0xff]  ;;  %802 = vmatprep.subr.bf16.mxu1 %v901_v0  ;;  %670 = vmatprep.mubr.msk.f32.mxu1 %vm902_vm0, %v903_v4  ;;  %v43_v8 = vld [vmem:[%s1275_s1 + $0x20] sm:$0xff]  ;;  %v44_v9 = vld [vmem:[%s1275_s1 + $0x28] sm:$0xff] }
   0x3   :  { %v782_v7 = vpack.c.bf16 %v42_v6, %v41_v3  ;;  %v133_v10 = vld [vmem:[%s1276_s3] sm:$0xff]  ;;  %v134_v11 = vld [vmem:[%s1276_s3 + $0x8] sm:$0xff]  ;;  %v135_v12 = vld [vmem:[%s1276_s3 + $0x10] sm:$0xff]  ;;  %v785_v14 = vpack.c.bf16 %v44_v9, %v43_v8 }
   0x4   :  { %780 = vmatpush3.bf16.msra.mxu0 %v779_v5  ;;  %v136_v13 = vld [vmem:[%s1276_s3 + $0x18] sm:$0xff]  ;;  %v803_v15 = vpack.c.bf16 %v134_v11, %v133_v10  ;;  %v45_v16 = vld [vmem:[%s1275_s1 + $0x30] sm:$0xff]  ;;  %v137_v19 = vld [vmem:[%s1276_s3 + $0x20] sm:$0xff] }
   0x5   :  { %781 = vmatprep.subr.bf16.mxu0 %v901_v0  ;;  %v46_v17 = vld [vmem:[%s1275_s1 + $0x38] sm:$0xff]  ;;  %v806_v18 = vpack.c.bf16 %v136_v13, %v135_v12  ;;  %v138_v20 = vld [vmem:[%s1276_s3 + $0x28] sm:$0xff]  ;;  %v47_v22 = vld [vmem:[%s1275_s1 + $0x40] sm:$0xff] }
   0x6   :  { %804 = vmatpush3.bf16.msra.mxu1 %v803_v15  ;;  %v788_v21 = vpack.c.bf16 %v46_v17, %v45_v16  ;;  %v48_v23 = vld [vmem:[%s1275_s1 + $0x48] sm:$0xff]  ;;  %v809_v24 = vpack.c.bf16 %v138_v20, %v137_v19  ;;  %v139_v25 = vld [vmem:[%s1276_s3 + $0x30] sm:$0xff]  ;;  %v140_v26 = vld [vmem:[%s1276_s3 + $0x38] sm:$0xff] }
   0x7   :  { %805 = vmatprep.subr.bf16.mxu1 %v901_v0  ;;  %v791_v27 = vpack.c.bf16 %v48_v23, %v47_v22  ;;  %v49_v28 = vld [vmem:[%s1275_s1 + $0x50] sm:$0xff]  ;;  %v50_v29 = vld [vmem:[%s1275_s1 + $0x58] sm:$0xff]  ;;  %v812_v30 = vpack.c.bf16 %v140_v26, %v139_v25  ;;  %v141_v31 = vld [vmem:[%s1276_s3 + $0x40] sm:$0xff] }
   0x8   :  { %783 = vmatpush3.bf16.msra.mxu0 %v782_v7  ;;  %v142_v32 = vld [vmem:[%s1276_s3 + $0x48] sm:$0xff]  ;;  %v794_v33 = vpack.c.bf16 %v50_v29, %v49_v28  ;;  %v51_v34 = vld [vmem:[%s1275_s1 + $0x60] sm:$0xff]  ;;  %v143_v37 = vld [vmem:[%s1276_s3 + $0x50] sm:$0xff] }
   0x9   :  { %784 = vmatprep.subr.bf16.mxu0 %v901_v0  ;;  %v52_v35 = vld [vmem:[%s1275_s1 + $0x68] sm:$0xff]  ;;  %v815_v36 = vpack.c.bf16 %v142_v32, %v141_v31  ;;  %v144_v38 = vld [vmem:[%s1276_s3 + $0x58] sm:$0xff]  ;;  %v53_v40 = vld [vmem:[%s1275_s1 + $0x70] sm:$0xff] }
   0xa   :  { %807 = vmatpush3.bf16.msra.mxu1 %v806_v18  ;;  %v797_v39 = vpack.c.bf16 %v52_v35, %v51_v34  ;;  %v54_v41 = vld [vmem:[%s1275_s1 + $0x78] sm:$0xff]  ;;  %v818_v42 = vpack.c.bf16 %v144_v38, %v143_v37  ;;  %v145_v43 = vld [vmem:[%s1276_s3 + $0x60] sm:$0xff]  ;;  %v146_v44 = vld [vmem:[%s1276_s3 + $0x68] sm:$0xff] }
   0xb   :  { %808 = vmatprep.subr.bf16.mxu1 %v901_v0  ;;  %v800_v45 = vpack.c.bf16 %v54_v41, %v53_v40  ;;  %v821_v46 = vpack.c.bf16 %v146_v44, %v145_v43  ;;  %v38_v47 = vld [vmem:[%s1277_s0] sm:$0xff]  ;;  %v147_v48 = vld [vmem:[%s1276_s3 + $0x70] sm:$0xff]  ;;  %v148_v49 = vld [vmem:[%s1276_s3 + $0x78] sm:$0xff] }
   0xc   :  { %786 = vmatpush3.bf16.msra.mxu0 %v785_v14  ;;  %v824_v50 = vpack.c.bf16 %v148_v49, %v147_v48  ;;  %v227_v51 = vld [vmem:[%s1278_s5] sm:$0xff]  ;;  %v228_v52 = vld [vmem:[%s1278_s5 + $0x8] sm:$0xff]  ;;  %v229_v53 = vld [vmem:[%s1278_s5 + $0x10] sm:$0xff] }
   0xd   :  { %787 = vmatprep.subr.bf16.mxu0 %v901_v0  ;;  %v827_v54 = vpack.c.bf16 %v228_v52, %v227_v51  ;;  %v230_v55 = vld [vmem:[%s1278_s5 + $0x18] sm:$0xff]  ;;  %v231_v57 = vld [vmem:[%s1278_s5 + $0x20] sm:$0xff]  ;;  %v232_v58 = vld [vmem:[%s1278_s5 + $0x28] sm:$0xff] }
   0xe   :  { %810 = vmatpush3.bf16.msra.mxu1 %v809_v24  ;;  %v830_v56 = vpack.c.bf16 %v230_v55, %v229_v53  ;;  %v833_v59 = vpack.c.bf16 %v232_v58, %v231_v57  ;;  %v233_v60 = vld [vmem:[%s1278_s5 + $0x30] sm:$0xff]  ;;  %v234_v61 = vld [vmem:[%s1278_s5 + $0x38] sm:$0xff]  ;;  %v235_v63 = vld [vmem:[%s1278_s5 + $0x40] sm:$0xff] }
   0xf   :  { %811 = vmatprep.subr.bf16.mxu1 %v901_v0  ;;  %v836_v62 = vpack.c.bf16 %v234_v61, %v233_v60  ;;  %v236_v1 = vld [vmem:[%s1278_s5 + $0x48] sm:$0xff]  ;;  %v237_v3 = vld [vmem:[%s1278_s5 + $0x50] sm:$0xff]  ;;  %v238_v5 = vld [vmem:[%s1278_s5 + $0x58] sm:$0xff] }
  0x10   :  { %789 = vmatpush3.bf16.msra.mxu0 %v788_v21  ;;  %v839_v2 = vpack.c.bf16 %v236_v1, %v235_v63  ;;  %v842_v6 = vpack.c.bf16 %v238_v5, %v237_v3  ;;  %v239_v7 = vld [vmem:[%s1278_s5 + $0x60] sm:$0xff]  ;;  %v240_v8 = vld [vmem:[%s1278_s5 + $0x68] sm:$0xff]  ;;  %v241_v15 = vld [vmem:[%s1278_s5 + $0x70] sm:$0xff] }
  0x11   :  { %790 = vmatprep.subr.bf16.mxu0 %v901_v0  ;;  %v845_v9 = vpack.c.bf16 %v240_v8, %v239_v7  ;;  %v513_v10 = vld [vmem:[%s1279_s2] ss:$0 sm:$0xff]  ;;  %v242_v16 = vld [vmem:[%s1278_s5 + $0x78] sm:$0xff]  ;;  %v322_v19 = vld [vmem:[%s1280_s7 + $0x8] sm:$0xff] }
  0x12   :  { %813 = vmatpush3.bf16.msra.mxu1 %v812_v30  ;;  %v848_v17 = vpack.c.bf16 %v242_v16, %v241_v15  ;;  %v321_v18 = vld [vmem:[%s1280_s7] sm:$0xff]  ;;  %v323_v20 = vld [vmem:[%s1280_s7 + $0x10] sm:$0xff]  ;;  %v324_v22 = vld [vmem:[%s1280_s7 + $0x18] sm:$0xff] }
  0x13   :  { %814 = vmatprep.subr.bf16.mxu1 %v901_v0  ;;  %v851_v21 = vpack.c.bf16 %v322_v19, %v321_v18  ;;  %v854_v23 = vpack.c.bf16 %v324_v22, %v323_v20  ;;  %v325_v24 = vld [vmem:[%s1280_s7 + $0x20] sm:$0xff]  ;;  %v326_v25 = vld [vmem:[%s1280_s7 + $0x28] sm:$0xff]  ;;  %v328_v28 = vld [vmem:[%s1280_s7 + $0x38] sm:$0xff] }
  0x14   :  { %792 = vmatpush3.bf16.msra.mxu0 %v791_v27  ;;  %v857_v26 = vpack.c.bf16 %v326_v25, %v325_v24  ;;  %v327_v27 = vld [vmem:[%s1280_s7 + $0x30] sm:$0xff]  ;;  %v329_v30 = vld [vmem:[%s1280_s7 + $0x40] sm:$0xff]  ;;  %v330_v31 = vld [vmem:[%s1280_s7 + $0x48] sm:$0xff] }
  0x15   :  { %793 = vmatprep.subr.bf16.mxu0 %v901_v0  ;;  %v860_v29 = vpack.c.bf16 %v328_v28, %v327_v27  ;;  %v863_v32 = vpack.c.bf16 %v330_v31, %v329_v30  ;;  %v332_v34 = vld [vmem:[%s1280_s7 + $0x58] sm:$0xff]  ;;  %v334_v37 = vld [vmem:[%s1280_s7 + $0x68] sm:$0xff]  ;;  %v335_v44 = vld [vmem:[%s1280_s7 + $0x70] sm:$0xff] }
  0x16   :  { %816 = vmatpush3.bf16.msra.mxu1 %v815_v36  ;;  %v333_v36 = vld [vmem:[%s1280_s7 + $0x60] sm:$0xff]  ;;  %v416_v48 = vld [vmem:[%s1282_s9 + $0x8] sm:$0xff]  ;;  %v421_v55 = vld [vmem:[%s1282_s9 + $0x30] sm:$0xff] }
  0x17   :  { %817 = vmatprep.subr.bf16.mxu1 %v901_v0  ;;  %v869_v38 = vpack.c.bf16 %v334_v37, %v333_v36  ;;  %v419_v52 = vld [vmem:[%s1282_s9 + $0x20] sm:$0xff]  ;;  %v420_v53 = vld [vmem:[%s1282_s9 + $0x28] sm:$0xff]  ;;  %v425_v61 = vld [vmem:[%s1282_s9 + $0x50] sm:$0xff] }
  0x18   :  { %795 = vmatpush3.bf16.msra.mxu0 %v794_v33  ;;  %v331_v33 = vld [vmem:[%s1280_s7 + $0x50] sm:$0xff]  ;;  %v423_v58 = vld [vmem:[%s1282_s9 + $0x40] sm:$0xff] }
  0x19   :  { %796 = vmatprep.subr.bf16.mxu0 %v901_v0  ;;  %v866_v35 = vpack.c.bf16 %v332_v34, %v331_v33  ;;  %v427_v1 = vld [vmem:[%s1282_s9 + $0x60] sm:$0xff] }
  0x1a   :  { %819 = vmatpush3.bf16.msra.mxu1 %v818_v42  ;;  %v515_v5 = vld [vmem:[%s1283_s6] ss:$0 sm:$0xff] }
  0x1b   :  { %820 = vmatprep.subr.bf16.mxu1 %v901_v0 }
  0x1c   :  { %798 = vmatpush3.bf16.msra.mxu0 %v797_v39  ;;  %v514_v39 = vld [vmem:[%s1281_s4] ss:$0 sm:$0xff] }
  0x1d   :  { %799 = vmatprep.subr.bf16.mxu0 %v901_v0 }
  0x1e   :  { %822 = vmatpush3.bf16.msra.mxu1 %v821_v46 }
  0x1f   :  { %823 = vmatprep.subr.bf16.mxu1 %v901_v0 }
  0x20   :  { %801 = vmatpush3.bf16.msra.mxu0 %v800_v45  ;;  %v336_v45 = vld [vmem:[%s1280_s7 + $0x78] sm:$0xff] }
  0x21   :  { %826 = vmatprep.subr.bf16.mxu0 %v901_v0  ;;  %v872_v46 = vpack.c.bf16 %v336_v45, %v335_v44 }
  0x22   :  { %825 = vmatpush3.bf16.msra.mxu1 %v824_v50  ;;  %v418_v50 = vld [vmem:[%s1282_s9 + $0x18] sm:$0xff] }
  0x23   :  { %636 = vmatmul.mubr.f32.vlgmr.msra.gmra.mrb[0].mxu0 %v38_v47  ;;  %850 = vmatprep.subr.bf16.mxu1 %v901_v0  ;;  %v415_v47 = vld [vmem:[%s1282_s9] sm:$0xff] }
  0x24   :  { %705 = vmatprep.mubr.msk.f32.mxu0 %vm902_vm0, %v903_v4  ;;  %828 = vmatpush3.bf16.msra.mxu0 %v827_v54  ;;  %v875_v49 = vpack.c.bf16 %v416_v48, %v415_v47  ;;  %v881_v54 = vpack.c.bf16 %v420_v53, %v419_v52 }
  0x25   :  { %829 = vmatprep.subr.bf16.mxu0 %v901_v0 }
  0x28   :  { %831 = vmatpush3.bf16.msra.mxu0 %v830_v56  ;;  %v422_v56 = vld [vmem:[%s1282_s9 + $0x38] sm:$0xff] }
  0x29   :  { %832 = vmatprep.subr.bf16.mxu0 %v901_v0  ;;  %v884_v57 = vpack.c.bf16 %v422_v56, %v421_v55 }
  0x2c   :  { %834 = vmatpush3.bf16.msra.mxu0 %v833_v59  ;;  %v424_v59 = vld [vmem:[%s1282_s9 + $0x48] sm:$0xff] }
  0x2d   :  { %835 = vmatprep.subr.bf16.mxu0 %v901_v0  ;;  %v887_v60 = vpack.c.bf16 %v424_v59, %v423_v58 }
  0x30   :  { %837 = vmatpush3.bf16.msra.mxu0 %v836_v62  ;;  %v426_v62 = vld [vmem:[%s1282_s9 + $0x58] sm:$0xff] }
  0x31   :  { %838 = vmatprep.subr.bf16.mxu0 %v901_v0  ;;  %v890_v63 = vpack.c.bf16 %v426_v62, %v425_v61 }
  0x34   :  { %840 = vmatpush3.bf16.msra.mxu0 %v839_v2  ;;  %v428_v2 = vld [vmem:[%s1282_s9 + $0x68] sm:$0xff] }
  0x35   :  { %841 = vmatprep.subr.bf16.mxu0 %v901_v0  ;;  %v893_v3 = vpack.c.bf16 %v428_v2, %v427_v1 }
  0x38   :  { %843 = vmatpush3.bf16.msra.mxu0 %v842_v6 }
  0x39   :  { %844 = vmatprep.subr.bf16.mxu0 %v901_v0 }
  0x3c   :  { %846 = vmatpush3.bf16.msra.mxu0 %v845_v9 }
  0x3d   :  { %847 = vmatprep.subr.bf16.mxu0 %v901_v0 }
  0x40   :  { %849 = vmatpush3.bf16.msra.mxu0 %v848_v17  ;;  %v517_v17 = vld [vmem:[%s1285_s10] ss:$0 sm:$0xff] }
  0x41   :  { %874 = vmatprep.subr.bf16.mxu0 %v901_v0 }
  0xf6   :  { %v128_v11 = vpop.f32.mrb[0].mxu0 }
  0xf7   :  { %v129_v12 = vadd.f32 %v513_v10, %v128_v11  ;;  %v637_v13 = vpop.f32.mrb[1].mxu0  ;;  %v429_v10 = vld [vmem:[%s1282_s9 + $0x70] sm:$0xff]  ;;  %v430_v11 = vld [vmem:[%s1282_s9 + $0x78] sm:$0xff] }
  0xf9   :  { %v132_v14 = vmax.f32 %v129_v12, 0.0  ;;  %v896_v12 = vpack.c.bf16 %v430_v11, %v429_v10 }
  0xfb   :  { %671 = vmatmul.mubr.f32.vlgmr.msra.gmra.mrb[0].mxu1 %v132_v14 }
  0xfc   :  { %740 = vmatprep.mubr.msk.f32.mxu1 %vm902_vm0, %v903_v4  ;;  %852 = vmatpush3.bf16.msra.mxu1 %v851_v21 }
  0xfd   :  { %853 = vmatprep.subr.bf16.mxu1 %v901_v0 }
 0x100   :  { %855 = vmatpush3.bf16.msra.mxu1 %v854_v23 }
 0x101   :  { %856 = vmatprep.subr.bf16.mxu1 %v901_v0 }
 0x104   :  { %858 = vmatpush3.bf16.msra.mxu1 %v857_v26 }
 0x105   :  { %859 = vmatprep.subr.bf16.mxu1 %v901_v0 }
 0x108   :  { %861 = vmatpush3.bf16.msra.mxu1 %v860_v29 }
 0x109   :  { %862 = vmatprep.subr.bf16.mxu1 %v901_v0 }
 0x10c   :  { %864 = vmatpush3.bf16.msra.mxu1 %v863_v32 }
 0x10d   :  { %865 = vmatprep.subr.bf16.mxu1 %v901_v0 }
 0x110   :  { %867 = vmatpush3.bf16.msra.mxu1 %v866_v35 }
 0x111   :  { %868 = vmatprep.subr.bf16.mxu1 %v901_v0 }
 0x114   :  { %870 = vmatpush3.bf16.msra.mxu1 %v869_v38 }
 0x115   :  { %871 = vmatprep.subr.bf16.mxu1 %v901_v0 }
 0x118   :  { %873 = vmatpush3.bf16.msra.mxu1 %v872_v46 }
 0x1ce   :  { %v222_v40 = vpop.f32.mrb[0].mxu1 }
 0x1cf   :  { %v223_v41 = vadd.f32 %v514_v39, %v222_v40  ;;  %v672_v42 = vpop.f32.mrb[1].mxu1 }
 0x1d1   :  { %v226_v43 = vmax.f32 %v223_v41, 0.0 }
 0x1d3   :  { %706 = vmatmul.mubr.f32.vlgmr.msra.gmra.mrb[2].mxu0 %v226_v43 }
 0x1d4   :  { %775 = vmatprep.mubr.msk.f32.mxu0 %vm902_vm0, %v903_v4  ;;  %v417_v4 = vld [vmem:[%s1282_s9 + $0x10] sm:$0xff]  ;;  %876 = vmatpush3.bf16.msra.mxu0 %v875_v49 }
 0x1d5   :  { %v878_v51 = vpack.c.bf16 %v418_v50, %v417_v4  ;;  %877 = vmatprep.subr.bf16.mxu0 %v901_v0 }
 0x1d8   :  { %879 = vmatpush3.bf16.msra.mxu0 %v878_v51 }
 0x1d9   :  { %880 = vmatprep.subr.bf16.mxu0 %v901_v0 }
 0x1dc   :  { %882 = vmatpush3.bf16.msra.mxu0 %v881_v54 }
 0x1dd   :  { %883 = vmatprep.subr.bf16.mxu0 %v901_v0 }
 0x1e0   :  { %885 = vmatpush3.bf16.msra.mxu0 %v884_v57 }
 0x1e1   :  { %886 = vmatprep.subr.bf16.mxu0 %v901_v0 }
 0x1e4   :  { %888 = vmatpush3.bf16.msra.mxu0 %v887_v60 }
 0x1e5   :  { %889 = vmatprep.subr.bf16.mxu0 %v901_v0 }
 0x1e8   :  { %891 = vmatpush3.bf16.msra.mxu0 %v890_v63 }
 0x1e9   :  { %892 = vmatprep.subr.bf16.mxu0 %v901_v0 }
 0x1ec   :  { %894 = vmatpush3.bf16.msra.mxu0 %v893_v3 }
 0x1ed   :  { %895 = vmatprep.subr.bf16.mxu0 %v901_v0  ;;  %v516_v0 = vld [vmem:[%s1284_s8] ss:$0 sm:$0xff] }
 0x1f0   :  { %897 = vmatpush3.bf16.msra.mxu0 %v896_v12 }
 0x2a6   :  { %v316_v6 = vpop.f32.mrb[2].mxu0 }
 0x2a7   :  { %v317_v7 = vadd.f32 %v515_v5, %v316_v6  ;;  %v707_v8 = vpop.f32.mrb[3].mxu0 }
 0x2a9   :  { %v320_v9 = vmax.f32 %v317_v7, 0.0 }
 0x2ab   :  { %741 = vmatmul.mubr.f32.vlgmr.msra.gmra.mrb[2].mxu1 %v320_v9 }
 0x37e   :  { %v410_v13 = vpop.f32.mrb[2].mxu1 }
 0x37f   :  { %v411_v14 = vadd.f32 %v516_v0, %v410_v13  ;;  %v742_v15 = vpop.f32.mrb[3].mxu1 }
 0x381   :  { %v414_v16 = vmax.f32 %v411_v14, 0.0 }
 0x383   :  { %776 = vmatmul.mubr.f32.vlgmr.msra.gmra.mrb[4].mxu0 %v414_v16 }
 0x456   :  { %v504_v18 = vpop.f32.mrb[4].mxu0 }
 0x457   :  { %v505_v19 = vadd.f32 %v517_v17, %v504_v18  ;;  %v777_v20 = vpop.f32.mrb[5].mxu0 }
 0x459   :  { %508 = vst [vmem:[%s1286_s11] sm:$0xff] %v505_v19 }

</bundles_post_ra>
